<compile_context>
chip_gen: v7x
topology: tpu7x:2x2x1
jax: 0.10.0
libtpu: 0.0.40
codegen_flags: <defaults>
</compile_context>

<pallas_src>
import functools
import math

import jax
import jax.numpy as jnp
from jax.experimental import pallas as pl
from jax.experimental.pallas import tpu as pltpu

SCALE_H = 5        # scale_factor=(5, 1)
_MAX_GROUPS = 16   # unroll budget for the lane-regrouping path (g*5 stores)


def _upsample_kernel(x_ref, o_ref, *, width, groups):
    # x_ref block: (rb, groups*width); o_ref block: (rb, groups*SCALE_H*width)
    # o[r, (j*SCALE_H + s)*width + w] = x[r, j*width + w]
    for j in range(groups):
        xj = x_ref[:, j * width:(j + 1) * width]
        base = j * SCALE_H
        for s in range(SCALE_H):
            o_ref[:, (base + s) * width:(base + s + 1) * width] = xj


def _tune_for_device():
    """Per-generation (target output-block bytes, vmem_limit_bytes | None)."""
    try:
        kind = jax.devices()[0].device_kind.lower()
    except Exception:
        kind = ""
    if "v5" in kind and ("lite" in kind or "v5e" in kind):
        return 4 << 20, None          # 16 MiB scoped-VMEM default: stay small.
    if "v7" in kind:
        return 10 << 20, 48 << 20     # 64 MiB physical VMEM, ~3.2 TB/s HBM.
    if "v6" in kind:
        return 12 << 20, 64 << 20     # 128 MiB physical VMEM, ~1.4 TB/s HBM.
    return 6 << 20, 48 << 20          # unknown (v4 / v5p / ...): moderate.


def _pick_rows_per_block(rows, out_row_bytes, sub, target_bytes):
    """Rows per block: multiple of the packed sublane tile, VMEM-bounded,
    and yielding >= 2 (preferably even) grid steps for megacore sharding."""
    if rows <= sub:
        return rows                                   # single full block
    rb = (target_bytes // max(out_row_bytes, 1)) // sub * sub
    rb = int(max(sub, min(rb, rows)))
    steps = -(-rows // rb)                            # cdiv
    if steps < 2:
        steps = 2
    elif steps % 2:
        steps += 1
    per_step = -(-rows // steps)                      # ceil(rows / steps)
    rb_even = -(-per_step // sub) * sub               # round up to sublane tile
    return int(max(sub, min(rb, rb_even)))


@jax.jit
def upsample_content(x):
    """Nearest-neighbour upsample by (5, 1) on an NCHW array via Pallas."""
    N, C, H, W = x.shape
    R = N * C * H
    itemsize = jnp.dtype(x.dtype).itemsize
    # Packed sublane tile: 8 (f32) / 16 (bf16) / 32 (int8 / fp8).
    sub = max(8, 32 // itemsize)

    # Lane-regrouping factor: smallest g with (g*W) % 128 == 0.
    groups = 1
    if W % 128 != 0:
        g = 128 // math.gcd(W, 128)
        if R % g == 0 and g <= _MAX_GROUPS:
            groups = g

    rows = R // groups
    in_w = groups * W
    out_w = groups * SCALE_H * W

    target_bytes, vmem_limit = _tune_for_device()
    rb = _pick_rows_per_block(rows, out_w * itemsize, sub, target_bytes)

    compiler_kwargs = dict(dimension_semantics=("parallel",))
    if vmem_limit is not None:
        compiler_kwargs["vmem_limit_bytes"] = vmem_limit

    kernel = functools.partial(_upsample_kernel, width=W, groups=groups)

    # Contiguous (metadata-only) reshape: (N, C, H, W) -> (rows, groups*W).
    x2d = x.reshape(rows, in_w)

    out2d = pl.pallas_call(
        kernel,
        out_shape=jax.ShapeDtypeStruct((rows, out_w), x.dtype),
        grid_spec=pltpu.PrefetchScalarGridSpec(
            num_scalar_prefetch=0,
            grid=(pl.cdiv(rows, rb),),
            in_specs=[pl.BlockSpec((rb, in_w), lambda i: (i, 0))],
            out_specs=pl.BlockSpec((rb, out_w), lambda i: (i, 0)),
        ),
        compiler_params=pltpu.CompilerParams(**compiler_kwargs),
        cost_estimate=pl.CostEstimate(
            flops=0,
            transcendentals=0,
            bytes_accessed=(1 + SCALE_H) * R * W * itemsize,
        ),
    )(x2d)

    # Contiguous (metadata-only) reshape to the final NCHW layout:
    # (rows, g*5*W) == flat(R, 5W) -> (N, C, 5H, W).
    return out2d.reshape(N, C, SCALE_H * H, W)


if __name__ == "__main__":
    key = jax.random.PRNGKey(0)
    N, C, H, W = 2, 4, 16, 16
    x = jax.random.normal(key, (N, C, H, W), dtype=jnp.float32)

    out = upsample_content(x)
    out = jax.block_until_ready(out)

    # Correctness check against plain-JAX nearest upsample (repeat along H).
    ref = jnp.repeat(x, SCALE_H, axis=2)
    assert out.shape == (N, C, H * SCALE_H, W), out.shape
    assert out.dtype == x.dtype
    assert jnp.array_equal(out, ref), "mismatch vs reference nearest upsample"

    print("KERNEL_OK")
</pallas_src>

<mosaic_0001>
module attributes {stable_mosaic.version = 11 : i64} {
  func.func @_upsample_kernel(%arg0: i32, %arg1: memref<8x128xf32, #tpu.memory_space<vmem>>, %arg2: memref<8x640xf32, #tpu.memory_space<vmem>>) attributes {dimension_semantics = [#tpu.dimension_semantics<parallel>], iteration_bounds = array<i64: 2>, scalar_prefetch = 0 : i64, scratch_operands = 0 : i64, tpu.core_type = #tpu.core_type<tc>, window_params = [{transform_indices = @transform_0, window_bounds = array<i64: 8, 128>}, {transform_indices = @transform_1, window_bounds = array<i64: 8, 640>}]} {
    %c0 = arith.constant 0 : index
    %c0_0 = arith.constant 0 : index
    %0 = vector.load %arg1[%c0, %c0_0] : memref<8x128xf32, #tpu.memory_space<vmem>>, vector<8x16xf32>
    %c0_1 = arith.constant 0 : index
    %c0_2 = arith.constant 0 : index
    %1 = vector.load %arg2[%c0_1, %c0_2] : memref<8x640xf32, #tpu.memory_space<vmem>>, vector<8x16xf32>
    tpu.vector_store %arg2[%c0_1, %c0_2], %0 {strides = array<i32>} : memref<8x640xf32, #tpu.memory_space<vmem>>, vector<8x16xf32>,
    %c0_3 = arith.constant 0 : index
    %c16 = arith.constant 16 : index
    %2 = vector.load %arg2[%c0_3, %c16] : memref<8x640xf32, #tpu.memory_space<vmem>>, vector<8x16xf32>
    tpu.vector_store %arg2[%c0_3, %c16], %0 {strides = array<i32>} : memref<8x640xf32, #tpu.memory_space<vmem>>, vector<8x16xf32>,
    %c0_4 = arith.constant 0 : index
    %c32 = arith.constant 32 : index
    %3 = vector.load %arg2[%c0_4, %c32] : memref<8x640xf32, #tpu.memory_space<vmem>>, vector<8x16xf32>
    tpu.vector_store %arg2[%c0_4, %c32], %0 {strides = array<i32>} : memref<8x640xf32, #tpu.memory_space<vmem>>, vector<8x16xf32>,
    %c0_5 = arith.constant 0 : index
    %c48 = arith.constant 48 : index
    %4 = vector.load %arg2[%c0_5, %c48] : memref<8x640xf32, #tpu.memory_space<vmem>>, vector<8x16xf32>
    tpu.vector_store %arg2[%c0_5, %c48], %0 {strides = array<i32>} : memref<8x640xf32, #tpu.memory_space<vmem>>, vector<8x16xf32>,
    %c0_6 = arith.constant 0 : index
    %c64 = arith.constant 64 : index
    %5 = vector.load %arg2[%c0_6, %c64] : memref<8x640xf32, #tpu.memory_space<vmem>>, vector<8x16xf32>
    tpu.vector_store %arg2[%c0_6, %c64], %0 {strides = array<i32>} : memref<8x640xf32, #tpu.memory_space<vmem>>, vector<8x16xf32>,
    %c0_7 = arith.constant 0 : index
    %c16_8 = arith.constant 16 : index
    %6 = vector.load %arg1[%c0_7, %c16_8] : memref<8x128xf32, #tpu.memory_space<vmem>>, vector<8x16xf32>
    %c0_9 = arith.constant 0 : index
    %c80 = arith.constant 80 : index
    %7 = vector.load %arg2[%c0_9, %c80] : memref<8x640xf32, #tpu.memory_space<vmem>>, vector<8x16xf32>
    tpu.vector_store %arg2[%c0_9, %c80], %6 {strides = array<i32>} : memref<8x640xf32, #tpu.memory_space<vmem>>, vector<8x16xf32>,
    %c0_10 = arith.constant 0 : index
    %c96 = arith.constant 96 : index
    %8 = vector.load %arg2[%c0_10, %c96] : memref<8x640xf32, #tpu.memory_space<vmem>>, vector<8x16xf32>
    tpu.vector_store %arg2[%c0_10, %c96], %6 {strides = array<i32>} : memref<8x640xf32, #tpu.memory_space<vmem>>, vector<8x16xf32>,
    %c0_11 = arith.constant 0 : index
    %c112 = arith.constant 112 : index
    %9 = vector.load %arg2[%c0_11, %c112] : memref<8x640xf32, #tpu.memory_space<vmem>>, vector<8x16xf32>
    tpu.vector_store %arg2[%c0_11, %c112], %6 {strides = array<i32>} : memref<8x640xf32, #tpu.memory_space<vmem>>, vector<8x16xf32>,
    %c0_12 = arith.constant 0 : index
    %c128 = arith.constant 128 : index
    %10 = vector.load %arg2[%c0_12, %c128] : memref<8x640xf32, #tpu.memory_space<vmem>>, vector<8x16xf32>
    tpu.vector_store %arg2[%c0_12, %c128], %6 {strides = array<i32>} : memref<8x640xf32, #tpu.memory_space<vmem>>, vector<8x16xf32>,
    %c0_13 = arith.constant 0 : index
    %c144 = arith.constant 144 : index
    %11 = vector.load %arg2[%c0_13, %c144] : memref<8x640xf32, #tpu.memory_space<vmem>>, vector<8x16xf32>
    tpu.vector_store %arg2[%c0_13, %c144], %6 {strides = array<i32>} : memref<8x640xf32, #tpu.memory_space<vmem>>, vector<8x16xf32>,
    %c0_14 = arith.constant 0 : index
    %c32_15 = arith.constant 32 : index
    %12 = vector.load %arg1[%c0_14, %c32_15] : memref<8x128xf32, #tpu.memory_space<vmem>>, vector<8x16xf32>
    %c0_16 = arith.constant 0 : index
    %c160 = arith.constant 160 : index
    %13 = vector.load %arg2[%c0_16, %c160] : memref<8x640xf32, #tpu.memory_space<vmem>>, vector<8x16xf32>
    tpu.vector_store %arg2[%c0_16, %c160], %12 {strides = array<i32>} : memref<8x640xf32, #tpu.memory_space<vmem>>, vector<8x16xf32>,
    %c0_17 = arith.constant 0 : index
    %c176 = arith.constant 176 : index
    %14 = vector.load %arg2[%c0_17, %c176] : memref<8x640xf32, #tpu.memory_space<vmem>>, vector<8x16xf32>
    tpu.vector_store %arg2[%c0_17, %c176], %12 {strides = array<i32>} : memref<8x640xf32, #tpu.memory_space<vmem>>, vector<8x16xf32>,
    %c0_18 = arith.constant 0 : index
    %c192 = arith.constant 192 : index
    %15 = vector.load %arg2[%c0_18, %c192] : memref<8x640xf32, #tpu.memory_space<vmem>>, vector<8x16xf32>
    tpu.vector_store %arg2[%c0_18, %c192], %12 {strides = array<i32>} : memref<8x640xf32, #tpu.memory_space<vmem>>, vector<8x16xf32>,
    %c0_19 = arith.constant 0 : index
    %c208 = arith.constant 208 : index
    %16 = vector.load %arg2[%c0_19, %c208] : memref<8x640xf32, #tpu.memory_space<vmem>>, vector<8x16xf32>
    tpu.vector_store %arg2[%c0_19, %c208], %12 {strides = array<i32>} : memref<8x640xf32, #tpu.memory_space<vmem>>, vector<8x16xf32>,
    %c0_20 = arith.constant 0 : index
    %c224 = arith.constant 224 : index
    %17 = vector.load %arg2[%c0_20, %c224] : memref<8x640xf32, #tpu.memory_space<vmem>>, vector<8x16xf32>
    tpu.vector_store %arg2[%c0_20, %c224], %12 {strides = array<i32>} : memref<8x640xf32, #tpu.memory_space<vmem>>, vector<8x16xf32>,
    %c0_21 = arith.constant 0 : index
    %c48_22 = arith.constant 48 : index
    %18 = vector.load %arg1[%c0_21, %c48_22] : memref<8x128xf32, #tpu.memory_space<vmem>>, vector<8x16xf32>
    %c0_23 = arith.constant 0 : index
    %c240 = arith.constant 240 : index
    %19 = vector.load %arg2[%c0_23, %c240] : memref<8x640xf32, #tpu.memory_space<vmem>>, vector<8x16xf32>
    tpu.vector_store %arg2[%c0_23, %c240], %18 {strides = array<i32>} : memref<8x640xf32, #tpu.memory_space<vmem>>, vector<8x16xf32>,
    %c0_24 = arith.constant 0 : index
    %c256 = arith.constant 256 : index
    %20 = vector.load %arg2[%c0_24, %c256] : memref<8x640xf32, #tpu.memory_space<vmem>>, vector<8x16xf32>
    tpu.vector_store %arg2[%c0_24, %c256], %18 {strides = array<i32>} : memref<8x640xf32, #tpu.memory_space<vmem>>, vector<8x16xf32>,
    %c0_25 = arith.constant 0 : index
    %c272 = arith.constant 272 : index
    %21 = vector.load %arg2[%c0_25, %c272] : memref<8x640xf32, #tpu.memory_space<vmem>>, vector<8x16xf32>
    tpu.vector_store %arg2[%c0_25, %c272], %18 {strides = array<i32>} : memref<8x640xf32, #tpu.memory_space<vmem>>, vector<8x16xf32>,
    %c0_26 = arith.constant 0 : index
    %c288 = arith.constant 288 : index
    %22 = vector.load %arg2[%c0_26, %c288] : memref<8x640xf32, #tpu.memory_space<vmem>>, vector<8x16xf32>
    tpu.vector_store %arg2[%c0_26, %c288], %18 {strides = array<i32>} : memref<8x640xf32, #tpu.memory_space<vmem>>, vector<8x16xf32>,
    %c0_27 = arith.constant 0 : index
    %c304 = arith.constant 304 : index
    %23 = vector.load %arg2[%c0_27, %c304] : memref<8x640xf32, #tpu.memory_space<vmem>>, vector<8x16xf32>
    tpu.vector_store %arg2[%c0_27, %c304], %18 {strides = array<i32>} : memref<8x640xf32, #tpu.memory_space<vmem>>, vector<8x16xf32>,
    %c0_28 = arith.constant 0 : index
    %c64_29 = arith.constant 64 : index
    %24 = vector.load %arg1[%c0_28, %c64_29] : memref<8x128xf32, #tpu.memory_space<vmem>>, vector<8x16xf32>
    %c0_30 = arith.constant 0 : index
    %c320 = arith.constant 320 : index
    %25 = vector.load %arg2[%c0_30, %c320] : memref<8x640xf32, #tpu.memory_space<vmem>>, vector<8x16xf32>
    tpu.vector_store %arg2[%c0_30, %c320], %24 {strides = array<i32>} : memref<8x640xf32, #tpu.memory_space<vmem>>, vector<8x16xf32>,
    %c0_31 = arith.constant 0 : index
    %c336 = arith.constant 336 : index
    %26 = vector.load %arg2[%c0_31, %c336] : memref<8x640xf32, #tpu.memory_space<vmem>>, vector<8x16xf32>
    tpu.vector_store %arg2[%c0_31, %c336], %24 {strides = array<i32>} : memref<8x640xf32, #tpu.memory_space<vmem>>, vector<8x16xf32>,
    %c0_32 = arith.constant 0 : index
    %c352 = arith.constant 352 : index
    %27 = vector.load %arg2[%c0_32, %c352] : memref<8x640xf32, #tpu.memory_space<vmem>>, vector<8x16xf32>
    tpu.vector_store %arg2[%c0_32, %c352], %24 {strides = array<i32>} : memref<8x640xf32, #tpu.memory_space<vmem>>, vector<8x16xf32>,
    %c0_33 = arith.constant 0 : index
    %c368 = arith.constant 368 : index
    %28 = vector.load %arg2[%c0_33, %c368] : memref<8x640xf32, #tpu.memory_space<vmem>>, vector<8x16xf32>
    tpu.vector_store %arg2[%c0_33, %c368], %24 {strides = array<i32>} : memref<8x640xf32, #tpu.memory_space<vmem>>, vector<8x16xf32>,
    %c0_34 = arith.constant 0 : index
    %c384 = arith.constant 384 : index
    %29 = vector.load %arg2[%c0_34, %c384] : memref<8x640xf32, #tpu.memory_space<vmem>>, vector<8x16xf32>
    tpu.vector_store %arg2[%c0_34, %c384], %24 {strides = array<i32>} : memref<8x640xf32, #tpu.memory_space<vmem>>, vector<8x16xf32>,
    %c0_35 = arith.constant 0 : index
    %c80_36 = arith.constant 80 : index
    %30 = vector.load %arg1[%c0_35, %c80_36] : memref<8x128xf32, #tpu.memory_space<vmem>>, vector<8x16xf32>
    %c0_37 = arith.constant 0 : index
    %c400 = arith.constant 400 : index
    %31 = vector.load %arg2[%c0_37, %c400] : memref<8x640xf32, #tpu.memory_space<vmem>>, vector<8x16xf32>
    tpu.vector_store %arg2[%c0_37, %c400], %30 {strides = array<i32>} : memref<8x640xf32, #tpu.memory_space<vmem>>, vector<8x16xf32>,
    %c0_38 = arith.constant 0 : index
    %c416 = arith.constant 416 : index
    %32 = vector.load %arg2[%c0_38, %c416] : memref<8x640xf32, #tpu.memory_space<vmem>>, vector<8x16xf32>
    tpu.vector_store %arg2[%c0_38, %c416], %30 {strides = array<i32>} : memref<8x640xf32, #tpu.memory_space<vmem>>, vector<8x16xf32>,
    %c0_39 = arith.constant 0 : index
    %c432 = arith.constant 432 : index
    %33 = vector.load %arg2[%c0_39, %c432] : memref<8x640xf32, #tpu.memory_space<vmem>>, vector<8x16xf32>
    tpu.vector_store %arg2[%c0_39, %c432], %30 {strides = array<i32>} : memref<8x640xf32, #tpu.memory_space<vmem>>, vector<8x16xf32>,
    %c0_40 = arith.constant 0 : index
    %c448 = arith.constant 448 : index
    %34 = vector.load %arg2[%c0_40, %c448] : memref<8x640xf32, #tpu.memory_space<vmem>>, vector<8x16xf32>
    tpu.vector_store %arg2[%c0_40, %c448], %30 {strides = array<i32>} : memref<8x640xf32, #tpu.memory_space<vmem>>, vector<8x16xf32>,
    %c0_41 = arith.constant 0 : index
    %c464 = arith.constant 464 : index
    %35 = vector.load %arg2[%c0_41, %c464] : memref<8x640xf32, #tpu.memory_space<vmem>>, vector<8x16xf32>
    tpu.vector_store %arg2[%c0_41, %c464], %30 {strides = array<i32>} : memref<8x640xf32, #tpu.memory_space<vmem>>, vector<8x16xf32>,
    %c0_42 = arith.constant 0 : index
    %c96_43 = arith.constant 96 : index
    %36 = vector.load %arg1[%c0_42, %c96_43] : memref<8x128xf32, #tpu.memory_space<vmem>>, vector<8x16xf32>
    %c0_44 = arith.constant 0 : index
    %c480 = arith.constant 480 : index
    %37 = vector.load %arg2[%c0_44, %c480] : memref<8x640xf32, #tpu.memory_space<vmem>>, vector<8x16xf32>
    tpu.vector_store %arg2[%c0_44, %c480], %36 {strides = array<i32>} : memref<8x640xf32, #tpu.memory_space<vmem>>, vector<8x16xf32>,
    %c0_45 = arith.constant 0 : index
    %c496 = arith.constant 496 : index
    %38 = vector.load %arg2[%c0_45, %c496] : memref<8x640xf32, #tpu.memory_space<vmem>>, vector<8x16xf32>
    tpu.vector_store %arg2[%c0_45, %c496], %36 {strides = array<i32>} : memref<8x640xf32, #tpu.memory_space<vmem>>, vector<8x16xf32>,
    %c0_46 = arith.constant 0 : index
    %c512 = arith.constant 512 : index
    %39 = vector.load %arg2[%c0_46, %c512] : memref<8x640xf32, #tpu.memory_space<vmem>>, vector<8x16xf32>
    tpu.vector_store %arg2[%c0_46, %c512], %36 {strides = array<i32>} : memref<8x640xf32, #tpu.memory_space<vmem>>, vector<8x16xf32>,
    %c0_47 = arith.constant 0 : index
    %c528 = arith.constant 528 : index
    %40 = vector.load %arg2[%c0_47, %c528] : memref<8x640xf32, #tpu.memory_space<vmem>>, vector<8x16xf32>
    tpu.vector_store %arg2[%c0_47, %c528], %36 {strides = array<i32>} : memref<8x640xf32, #tpu.memory_space<vmem>>, vector<8x16xf32>,
    %c0_48 = arith.constant 0 : index
    %c544 = arith.constant 544 : index
    %41 = vector.load %arg2[%c0_48, %c544] : memref<8x640xf32, #tpu.memory_space<vmem>>, vector<8x16xf32>
    tpu.vector_store %arg2[%c0_48, %c544], %36 {strides = array<i32>} : memref<8x640xf32, #tpu.memory_space<vmem>>, vector<8x16xf32>,
    %c0_49 = arith.constant 0 : index
    %c112_50 = arith.constant 112 : index
    %42 = vector.load %arg1[%c0_49, %c112_50] : memref<8x128xf32, #tpu.memory_space<vmem>>, vector<8x16xf32>
    %c0_51 = arith.constant 0 : index
    %c560 = arith.constant 560 : index
    %43 = vector.load %arg2[%c0_51, %c560] : memref<8x640xf32, #tpu.memory_space<vmem>>, vector<8x16xf32>
    tpu.vector_store %arg2[%c0_51, %c560], %42 {strides = array<i32>} : memref<8x640xf32, #tpu.memory_space<vmem>>, vector<8x16xf32>,
    %c0_52 = arith.constant 0 : index
    %c576 = arith.constant 576 : index
    %44 = vector.load %arg2[%c0_52, %c576] : memref<8x640xf32, #tpu.memory_space<vmem>>, vector<8x16xf32>
    tpu.vector_store %arg2[%c0_52, %c576], %42 {strides = array<i32>} : memref<8x640xf32, #tpu.memory_space<vmem>>, vector<8x16xf32>,
    %c0_53 = arith.constant 0 : index
    %c592 = arith.constant 592 : index
    %45 = vector.load %arg2[%c0_53, %c592] : memref<8x640xf32, #tpu.memory_space<vmem>>, vector<8x16xf32>
    tpu.vector_store %arg2[%c0_53, %c592], %42 {strides = array<i32>} : memref<8x640xf32, #tpu.memory_space<vmem>>, vector<8x16xf32>,
    %c0_54 = arith.constant 0 : index
    %c608 = arith.constant 608 : index
    %46 = vector.load %arg2[%c0_54, %c608] : memref<8x640xf32, #tpu.memory_space<vmem>>, vector<8x16xf32>
    tpu.vector_store %arg2[%c0_54, %c608], %42 {strides = array<i32>} : memref<8x640xf32, #tpu.memory_space<vmem>>, vector<8x16xf32>,
    %c0_55 = arith.constant 0 : index
    %c624 = arith.constant 624 : index
    %47 = vector.load %arg2[%c0_55, %c624] : memref<8x640xf32, #tpu.memory_space<vmem>>, vector<8x16xf32>
    tpu.vector_store %arg2[%c0_55, %c624], %42 {strides = array<i32>} : memref<8x640xf32, #tpu.memory_space<vmem>>, vector<8x16xf32>,
    return
  }
  func.func @transform_0(%arg0: i32) -> (i32, i32) {
    %c0_i32 = arith.constant 0 : i32
    %c0_i32_0 = arith.constant 0 : i32
    return %arg0, %c0_i32 : i32, i32
  }
  func.func @transform_1(%arg0: i32) -> (i32, i32) {
    %c0_i32 = arith.constant 0 : i32
    %c0_i32_0 = arith.constant 0 : i32
    return %arg0, %c0_i32 : i32, i32
  }
}

</mosaic_0001>

<bundles_post_ra>
// kernel: upsample_content.1
= control target key start
LH: loop header
LB: loop body
LE: loop exit
PB: predicated region body
PF: predicated region fallthrough
CT: control target
= control target key end

     0   :  { %s379_s6 = smov 0   ;;  %s526_s0 = inlined_call_operand.vmem [shape: f32[16,128], index: 0, kind: input, shape index: {}]   ;;  %s527_s1 = inlined_call_operand.vmem [shape: f32[16,640], index: 1, kind: output, shape index: {}]  }
   0x1 LB: > { %s329_s7 = sadd.s32 4294967295, %s360_s6   ;;  %p333_p0 = scmp.ge.s32.totalorder %s360_s6, 1  ;;  %s360_s6 = sphi %s379_s6, %s11_s6  }
   0x2   : > { %p86_p1 = scmp.lt.s32.totalorder %s360_s6, 3 }
   0x4   : > { %p87_p2 = pnand %p333_p0, %p86_p1 }
   0x5   : > { %p105_p3 = scmp.lt.s32.totalorder (!%p87_p2), %s329_s7, 1  ;;  %vm115_vm0 = vcmask (!%p87_p2), 130048   ;;  %s362_s16 = smov (!%p87_p2), 64   ;;  %vm121_vm1 = vcmask (!%p87_p2), 261248   ;;  %vm126_vm2 = vcmask (!%p87_p2), 392448   ;;  %vm131_vm3 = vcmask (!%p87_p2), 523648  }
   0x6   : > { %90 = sbr.rel (%p87_p2) target bundleno = 193 (0xc1), region = 24  ;;  %s363_s17 = smov (!%p87_p2), 112   ;;  %vm136_vm4 = vcmask (!%p87_p2), 654848   ;;  %vm143_vm5 = vcmask (!%p87_p2), 786048   ;;  %vm148_vm6 = vcmask (!%p87_p2), 917248   ;;  %vm153_vm7 = vcmask (!%p87_p2), 1048448  }
   0x7   : > { %s364_s18 = smov (!%p87_p2), 32   ;;  %s365_s19 = smov (!%p87_p2), 80  }
   0x8   : > { %s366_s20 = smov (!%p87_p2), 96   ;;  %s367_s21 = smov (!%p87_p2), 16  }
   0x9   : > { %s368_s22 = smov (!%p87_p2), 48  }
   0xd   : > { %s529_s7 = smov (!%p105_p3, %s329_s7), 1 }
   0xe   : > { %s334_s8 = sshll.u32 %s529_s7, 3  ;;  %s338_s9 = smul.u32 40, %s529_s7 }
   0xf   : > { %s108_s12 = scalar_lea.vmem %s526_s0, %s334_s8 }
  0x10   : > { %s393_s15 = scalar_lea.vmem %s527_s1, %s338_s9  ;;  %v395_v0 = vld [vmem:[%s108_s12] sm:$0xff] }
  0x11   : > { %213 = vrot.lane.b32.xlu1 %v395_v0, %s362_s16  ;;  %155 = vrot.lane.b32.xlu0 %v395_v0, %s363_s17  ;;  %116 = vst.msk [vmem:[%s393_s15] sm:$0xff] %vm115_vm0, %v395_v0 }
  0x15   : > { %243 = vrot.lane.b32.xlu1 %v395_v0, %s364_s18  ;;  %185 = vrot.lane.b32.xlu0 %v395_v0, %s365_s19 }
  0x19   : > { %189 = vrot.lane.b32.xlu1 %v395_v0, %s366_s20  ;;  %118 = vrot.lane.b32.xlu0 %v395_v0, %s367_s21 }
  0x1d   : > { %247 = vrot.lane.b32.xlu1 %v395_v0, %s368_s22  ;;  %219 = vrot.lane.b32.xlu0 %v395_v0, %s362_s16 }
  0x21   : > { %193 = vrot.lane.b32.xlu1 %v395_v0, %s363_s17  ;;  %123 = vrot.lane.b32.xlu0 %v395_v0, %s364_s18 }
  0x25   : > { %251 = vrot.lane.b32.xlu1 %v395_v0, %s362_s16  ;;  %223 = vrot.lane.b32.xlu0 %v395_v0, %s365_s19 }
  0x29   : > { %163 = vrot.lane.b32.xlu1 %v395_v0, %s367_s21  ;;  %128 = vrot.lane.b32.xlu0 %v395_v0, %s368_s22 }
  0x2d   : > { %257 = vrot.lane.b32.xlu1 %v395_v0, %s362_s16  ;;  %227 = vrot.lane.b32.xlu0 %v395_v0, %s366_s20 }
  0x31   : > { %167 = vrot.lane.b32.xlu1 %v395_v0, %s364_s18  ;;  %133 = vrot.lane.b32.xlu0 %v395_v0, %s362_s16 }
  0x35   : > { %261 = vrot.lane.b32.xlu1 %v395_v0, %s365_s19  ;;  %231 = vrot.lane.b32.xlu0 %v395_v0, %s363_s17 }
  0x39   : > { %171 = vrot.lane.b32.xlu1 %v395_v0, %s368_s22  ;;  %140 = vrot.lane.b32.xlu0 %v395_v0, %s362_s16 }
  0x3d   : > { %265 = vrot.lane.b32.xlu1 %v395_v0, %s366_s20  ;;  %201 = vrot.lane.b32.xlu0 %v395_v0, %s367_s21 }
  0x41   : > { %175 = vrot.lane.b32.xlu1 %v395_v0, %s362_s16  ;;  %145 = vrot.lane.b32.xlu0 %v395_v0, %s365_s19 }
  0x45   : > { %269 = vrot.lane.b32.xlu1 %v395_v0, %s363_s17  ;;  %205 = vrot.lane.b32.xlu0 %v395_v0, %s364_s18 }
  0x49   : > { %181 = vrot.lane.b32.xlu1 %v395_v0, %s362_s16  ;;  %150 = vrot.lane.b32.xlu0 %v395_v0, %s366_s20 }
  0x4d   : > { %239 = vrot.lane.b32.xlu1 %v395_v0, %s367_s21  ;;  %209 = vrot.lane.b32.xlu0 %v395_v0, %s368_s22 }
  0x83   : > { %v214_v1 = vpop.permute.xlu1 %213  ;;  %v156_v2 = vpop.permute.xlu0 %155 }
  0x84   : > { %216 = vst.msk [vmem:[%s393_s15 + $0x18] sm:$0xff] %vm115_vm0, %v214_v1  ;;  %158 = vst.msk [vmem:[%s393_s15 + $0x8] sm:$0xff] %vm115_vm0, %v156_v2 }
  0x85   : > { %159 = vst.msk [vmem:[%s393_s15 + $0x8] sm:$0xff] %vm121_vm1, %v395_v0 }
  0x86   : > { %161 = vst.msk [vmem:[%s393_s15 + $0x8] sm:$0xff] %vm126_vm2, %v395_v0 }
  0x87   : > { %v244_v3 = vpop.permute.xlu1 %243  ;;  %v186_v4 = vpop.permute.xlu0 %185 }
  0x88   : > { %246 = vst.msk [vmem:[%s393_s15 + $0x20] sm:$0xff] %vm115_vm0, %v244_v3  ;;  %188 = vst.msk [vmem:[%s393_s15 + $0x10] sm:$0xff] %vm115_vm0, %v186_v4 }
  0x8b   : > { %v190_v5 = vpop.permute.xlu1 %189  ;;  %v119_v6 = vpop.permute.xlu0 %118 }
  0x8c   : > { %192 = vst.msk [vmem:[%s393_s15 + $0x10] sm:$0xff] %vm121_vm1, %v190_v5  ;;  %122 = vst.msk [vmem:[%s393_s15] sm:$0xff] %vm121_vm1, %v119_v6 }
  0x8f   : > { %v248_v7 = vpop.permute.xlu1 %247  ;;  %v220_v8 = vpop.permute.xlu0 %219 }
  0x90   : > { %250 = vst.msk [vmem:[%s393_s15 + $0x20] sm:$0xff] %vm121_vm1, %v248_v7  ;;  %222 = vst.msk [vmem:[%s393_s15 + $0x18] sm:$0xff] %vm121_vm1, %v220_v8 }
  0x93   : > { %v194_v9 = vpop.permute.xlu1 %193  ;;  %v124_v10 = vpop.permute.xlu0 %123 }
  0x94   : > { %196 = vst.msk [vmem:[%s393_s15 + $0x10] sm:$0xff] %vm126_vm2, %v194_v9  ;;  %127 = vst.msk [vmem:[%s393_s15] sm:$0xff] %vm126_vm2, %v124_v10 }
  0x95   : > { %197 = vst.msk [vmem:[%s393_s15 + $0x10] sm:$0xff] %vm131_vm3, %v395_v0 }
  0x96   : > { %199 = vst.msk [vmem:[%s393_s15 + $0x10] sm:$0xff] %vm136_vm4, %v395_v0 }
  0x97   : > { %v252_v11 = vpop.permute.xlu1 %251  ;;  %v224_v12 = vpop.permute.xlu0 %223 }
  0x98   : > { %254 = vst.msk [vmem:[%s393_s15 + $0x20] sm:$0xff] %vm126_vm2, %v252_v11  ;;  %226 = vst.msk [vmem:[%s393_s15 + $0x18] sm:$0xff] %vm126_vm2, %v224_v12 }
  0x9b   : > { %v164_v13 = vpop.permute.xlu1 %163  ;;  %v129_v14 = vpop.permute.xlu0 %128 }
  0x9c   : > { %166 = vst.msk [vmem:[%s393_s15 + $0x8] sm:$0xff] %vm131_vm3, %v164_v13  ;;  %132 = vst.msk [vmem:[%s393_s15] sm:$0xff] %vm131_vm3, %v129_v14 }
  0x9f   : > { %v258_v15 = vpop.permute.xlu1 %257  ;;  %v228_v16 = vpop.permute.xlu0 %227 }
  0xa0   : > { %260 = vst.msk [vmem:[%s393_s15 + $0x20] sm:$0xff] %vm131_vm3, %v258_v15  ;;  %230 = vst.msk [vmem:[%s393_s15 + $0x18] sm:$0xff] %vm131_vm3, %v228_v16 }
  0xa3   : > { %v168_v17 = vpop.permute.xlu1 %167  ;;  %v134_v18 = vpop.permute.xlu0 %133 }
  0xa4   : > { %170 = vst.msk [vmem:[%s393_s15 + $0x8] sm:$0xff] %vm136_vm4, %v168_v17  ;;  %137 = vst.msk [vmem:[%s393_s15] sm:$0xff] %vm136_vm4, %v134_v18 }
  0xa7   : > { %v262_v19 = vpop.permute.xlu1 %261  ;;  %v232_v20 = vpop.permute.xlu0 %231 }
  0xa8   : > { %264 = vst.msk [vmem:[%s393_s15 + $0x20] sm:$0xff] %vm136_vm4, %v262_v19  ;;  %234 = vst.msk [vmem:[%s393_s15 + $0x18] sm:$0xff] %vm136_vm4, %v232_v20 }
  0xa9   : > { %235 = vst.msk [vmem:[%s393_s15 + $0x18] sm:$0xff] %vm143_vm5, %v395_v0 }
  0xaa   : > { %237 = vst.msk [vmem:[%s393_s15 + $0x18] sm:$0xff] %vm148_vm6, %v395_v0 }
  0xab   : > { %v172_v21 = vpop.permute.xlu1 %171  ;;  %v141_v22 = vpop.permute.xlu0 %140 }
  0xac   : > { %174 = vst.msk [vmem:[%s393_s15 + $0x8] sm:$0xff] %vm143_vm5, %v172_v21  ;;  %144 = vst.msk [vmem:[%s393_s15] sm:$0xff] %vm143_vm5, %v141_v22 }
  0xaf   : > { %v266_v23 = vpop.permute.xlu1 %265  ;;  %v202_v24 = vpop.permute.xlu0 %201 }
  0xb0   : > { %268 = vst.msk [vmem:[%s393_s15 + $0x20] sm:$0xff] %vm143_vm5, %v266_v23  ;;  %204 = vst.msk [vmem:[%s393_s15 + $0x10] sm:$0xff] %vm143_vm5, %v202_v24 }
  0xb3   : > { %v176_v25 = vpop.permute.xlu1 %175  ;;  %v146_v26 = vpop.permute.xlu0 %145 }
  0xb4   : > { %178 = vst.msk [vmem:[%s393_s15 + $0x8] sm:$0xff] %vm148_vm6, %v176_v25  ;;  %149 = vst.msk [vmem:[%s393_s15] sm:$0xff] %vm148_vm6, %v146_v26 }
  0xb7   : > { %v270_v27 = vpop.permute.xlu1 %269  ;;  %v206_v28 = vpop.permute.xlu0 %205 }
  0xb8   : > { %272 = vst.msk [vmem:[%s393_s15 + $0x20] sm:$0xff] %vm148_vm6, %v270_v27  ;;  %208 = vst.msk [vmem:[%s393_s15 + $0x10] sm:$0xff] %vm148_vm6, %v206_v28 }
  0xb9   : > { %273 = vst.msk [vmem:[%s393_s15 + $0x20] sm:$0xff] %vm153_vm7, %v395_v0 }
  0xbb   : > { %v182_v29 = vpop.permute.xlu1 %181  ;;  %v151_v30 = vpop.permute.xlu0 %150 }
  0xbc   : > { %184 = vst.msk [vmem:[%s393_s15 + $0x8] sm:$0xff] %vm153_vm7, %v182_v29  ;;  %154 = vst.msk [vmem:[%s393_s15] sm:$0xff] %vm153_vm7, %v151_v30 }
  0xbf   : > { %v240_v31 = vpop.permute.xlu1 %239  ;;  %v210_v32 = vpop.permute.xlu0 %209 }
  0xc0   : > { %242 = vst.msk [vmem:[%s393_s15 + $0x18] sm:$0xff] %vm153_vm7, %v240_v31  ;;  %212 = vst.msk [vmem:[%s393_s15 + $0x10] sm:$0xff] %vm153_vm7, %v210_v32 }
  0xc1 PF: > { %s11_s6 = sadd.s32 1, %s360_s6  }
  0xc2   : > { %p8_p4 = scmp.ge.s32.totalorder %s11_s6, 4  }
  0xc4   :  { %10 = sbr.rel (!%p8_p4) target bundleno = 1 (0x1), region = 54 }

</bundles_post_ra>
